<compile_context>
chip_gen: v7x
topology: tpu7x:2x2x1
jax: 0.10.0
libtpu: 0.0.40
codegen_flags: <defaults>
</compile_context>

<pallas_src>
import functools

import jax
import jax.numpy as jnp
import numpy as np
from jax.experimental import pallas as pl
from jax.experimental.pallas import tpu as pltpu  # noqa: F401  (kept for TPU-specific tuning hooks)


def gcn_fused_kernel(n_layers, fts_ref, adj_ref, *refs):
    """Fused n-layer GCN: h_{l+1} = relu_if_not_last( adj @ (h_l @ W_l + b_l) * inv_deg )."""
    out_ref = refs[-1]
    param_refs = refs[:-1]  # interleaved (w0, b0, w1, b1, ...)

    adj = adj_ref[...]                                         # [N, N]
    # Degree normalization computed ONCE for all layers; 1/x on the EUP.
    deg = jnp.sum(adj, axis=1, keepdims=True)                  # [N, 1]
    inv_deg = pl.reciprocal(deg, approx=False)                 # [N, 1]

    h = fts_ref[...]                                           # [N, F_in]
    for i in range(n_layers):
        w = param_refs[2 * i][...]                             # [F_in_l, F_out_l]
        b = param_refs[2 * i + 1][...]                         # [1, F_out_l]
        # Project first (narrow F_out), then aggregate with adj on the narrow dim.
        h = jnp.dot(h, w, preferred_element_type=jnp.float32) + b
        h = jnp.dot(adj, h, preferred_element_type=jnp.float32) * inv_deg
        if i < n_layers - 1:
            h = jnp.maximum(h, 0.0)
    out_ref[...] = h.astype(out_ref.dtype)


def gcn_forward(fts, adj, params):
    """params: list of (W [F_in, F_out], b [F_out]) per layer. Single fused pallas_call."""
    N, _ = fts.shape
    n_layers = len(params)
    f_out = params[-1][0].shape[1]
    # Lane-dense final output width (multiple of 128) -> unmasked stores.
    f_out_pad = ((f_out + 127) // 128) * 128

    flat_args = []
    in_specs = [
        pl.BlockSpec(fts.shape, lambda: (0, 0)),
        pl.BlockSpec(adj.shape, lambda: (0, 0)),
    ]
    for i, (w, b) in enumerate(params):
        if i == n_layers - 1 and f_out_pad != f_out:
            # Zero-pad the last layer's weight/bias; extra lanes stay exactly 0.
            w = jnp.pad(w, ((0, 0), (0, f_out_pad - f_out)))
            b = jnp.pad(b, (0, f_out_pad - f_out))
        b2d = b.reshape(1, -1)
        flat_args += [w, b2d]
        in_specs += [
            pl.BlockSpec(w.shape, lambda: (0, 0)),
            pl.BlockSpec(b2d.shape, lambda: (0, 0)),
        ]

    kernel = functools.partial(gcn_fused_kernel, n_layers)
    out_padded = pl.pallas_call(
        kernel,
        out_shape=jax.ShapeDtypeStruct((N, f_out_pad), jnp.float32),
        in_specs=in_specs,
        out_specs=pl.BlockSpec((N, f_out_pad), lambda: (0, 0)),
    )(fts, adj, *flat_args)
    return out_padded[:, :f_out]


def init_linear_params(key, f_in, f_out):
    """Deterministic init mimicking nn.Linear (uniform +/- 1/sqrt(f_in))."""
    kw, kb = jax.random.split(key)
    bound = 1.0 / np.sqrt(f_in)
    # Stored already transposed: [F_in, F_out].
    w = jax.random.uniform(kw, (f_in, f_out), jnp.float32, -bound, bound)
    b = jax.random.uniform(kb, (f_out,), jnp.float32, -bound, bound)
    return w, b


def reference_forward(fts, adj, params):
    """Pure-JAX reference with the exact PyTorch semantics (divide by deg)."""
    deg = adj.sum(axis=1, keepdims=True)
    h = fts
    n_layers = len(params)
    for i, (w, b) in enumerate(params):
        h = h @ w + b
        h = (adj @ h) / deg
        if i < n_layers - 1:
            h = jnp.maximum(h, 0.0)
    return h


if __name__ == "__main__":
    # Small shapes consistent with the module: N nodes, in=128, hid=32, out=7.
    N, SZ_IN, SZ_HID, SZ_OUT = 32, 128, 32, 7
    NUM_LAYERS = 2

    key = jax.random.PRNGKey(0)
    k_fts, k_adj, k_p0, k_p1 = jax.random.split(key, 4)

    fts = jax.random.normal(k_fts, (N, SZ_IN), jnp.float32)
    # Random 0/1 adjacency with self-loops so deg >= 1 (no division by zero,
    # matching the PyTorch module's implicit assumption).
    adj = (jax.random.uniform(k_adj, (N, N)) > 0.6).astype(jnp.float32)
    adj = jnp.maximum(adj, jnp.eye(N, dtype=jnp.float32))

    params = [
        init_linear_params(k_p0, SZ_IN, SZ_HID),
        init_linear_params(k_p1, SZ_HID, SZ_OUT),
    ]
    assert len(params) == NUM_LAYERS

    out = gcn_forward(fts, adj, params)
    out = jax.block_until_ready(out)

    ref = reference_forward(fts, adj, params)
    np.testing.assert_allclose(np.asarray(out), np.asarray(ref),
                               rtol=1e-5, atol=1e-5)
    print("KERNEL_OK")
</pallas_src>

<mosaic_0001>
module attributes {stable_mosaic.version = 11 : i64} {
  func.func @gcn_fused_kernel(%arg0: memref<32x128xf32, #tpu.memory_space<vmem>>, %arg1: memref<32x32xf32, #tpu.memory_space<vmem>>, %arg2: memref<128x32xf32, #tpu.memory_space<vmem>>, %arg3: memref<1x32xf32, #tpu.memory_space<vmem>>, %arg4: memref<32x128xf32, #tpu.memory_space<vmem>>, %arg5: memref<1x128xf32, #tpu.memory_space<vmem>>, %arg6: memref<32x128xf32, #tpu.memory_space<vmem>>) attributes {dimension_semantics = [], scalar_prefetch = 0 : i64, scratch_operands = 0 : i64, tpu.core_type = #tpu.core_type<tc>} {
    %c0 = arith.constant 0 : index
    %c0_0 = arith.constant 0 : index
    %0 = vector.load %arg1[%c0, %c0_0] : memref<32x32xf32, #tpu.memory_space<vmem>>, vector<32x32xf32>
    %cst = arith.constant dense<0.000000e+00> : vector<32xf32>
    %1 = vector.multi_reduction <add>, %0, %cst [1] : vector<32x32xf32> to vector<32xf32>
    %2 = vector.shape_cast %1 : vector<32xf32> to vector<32x1xf32>
    %3 = tpu.reciprocal %2 : vector<32x1xf32> -> vector<32x1xf32>
    %c0_1 = arith.constant 0 : index
    %c0_2 = arith.constant 0 : index
    %4 = vector.load %arg0[%c0_1, %c0_2] : memref<32x128xf32, #tpu.memory_space<vmem>>, vector<32x128xf32>
    %c0_3 = arith.constant 0 : index
    %c0_4 = arith.constant 0 : index
    %5 = vector.load %arg2[%c0_3, %c0_4] : memref<128x32xf32, #tpu.memory_space<vmem>>, vector<128x32xf32>
    %c0_5 = arith.constant 0 : index
    %c0_6 = arith.constant 0 : index
    %6 = vector.load %arg3[%c0_5, %c0_6] : memref<1x32xf32, #tpu.memory_space<vmem>>, vector<1x32xf32>
    %cst_7 = arith.constant dense<0.000000e+00> : vector<32x32xf32>
    %7 = tpu.matmul %4, %5, %cst_7 {dimension_numbers = #tpu.dot_dimension_numbers<[1], [0], [0], [1], [0, 0, 1, 1], [], []>} : vector<32x128xf32>, vector<128x32xf32>, vector<32x32xf32> -> vector<32x32xf32>
    %8 = vector.broadcast %6 : vector<1x32xf32> to vector<32x32xf32>
    %9 = arith.addf %7, %8 : vector<32x32xf32>
    %cst_8 = arith.constant dense<0.000000e+00> : vector<32x32xf32>
    %10 = tpu.matmul %0, %9, %cst_8 {dimension_numbers = #tpu.dot_dimension_numbers<[1], [0], [0], [1], [0, 0, 1, 1], [], []>} : vector<32x32xf32>, vector<32x32xf32>, vector<32x32xf32> -> vector<32x32xf32>
    %11 = vector.broadcast %3 : vector<32x1xf32> to vector<32x32xf32>
    %12 = arith.mulf %10, %11 : vector<32x32xf32>
    %cst_9 = arith.constant 0.000000e+00 : f32
    %13 = vector.broadcast %cst_9 : f32 to vector<32x32xf32>
    %14 = arith.maximumf %12, %13 : vector<32x32xf32>
    %c0_10 = arith.constant 0 : index
    %c0_11 = arith.constant 0 : index
    %15 = vector.load %arg4[%c0_10, %c0_11] : memref<32x128xf32, #tpu.memory_space<vmem>>, vector<32x128xf32>
    %c0_12 = arith.constant 0 : index
    %c0_13 = arith.constant 0 : index
    %16 = vector.load %arg5[%c0_12, %c0_13] : memref<1x128xf32, #tpu.memory_space<vmem>>, vector<1x128xf32>
    %cst_14 = arith.constant dense<0.000000e+00> : vector<32x128xf32>
    %17 = tpu.matmul %14, %15, %cst_14 {dimension_numbers = #tpu.dot_dimension_numbers<[1], [0], [0], [1], [0, 0, 1, 1], [], []>} : vector<32x32xf32>, vector<32x128xf32>, vector<32x128xf32> -> vector<32x128xf32>
    %18 = vector.broadcast %16 : vector<1x128xf32> to vector<32x128xf32>
    %19 = arith.addf %17, %18 : vector<32x128xf32>
    %cst_15 = arith.constant dense<0.000000e+00> : vector<32x128xf32>
    %20 = tpu.matmul %0, %19, %cst_15 {dimension_numbers = #tpu.dot_dimension_numbers<[1], [0], [0], [1], [0, 0, 1, 1], [], []>} : vector<32x32xf32>, vector<32x128xf32>, vector<32x128xf32> -> vector<32x128xf32>
    %21 = vector.broadcast %3 : vector<32x1xf32> to vector<32x128xf32>
    %22 = arith.mulf %20, %21 : vector<32x128xf32>
    %c0_16 = arith.constant 0 : index
    %c0_17 = arith.constant 0 : index
    %23 = vector.load %arg6[%c0_16, %c0_17] : memref<32x128xf32, #tpu.memory_space<vmem>>, vector<32x128xf32>
    tpu.vector_store %arg6[%c0_16, %c0_17], %22 {strides = array<i32>} : memref<32x128xf32, #tpu.memory_space<vmem>>, vector<32x128xf32>,
    return
  }
}

</mosaic_0001>

<bundles_post_ra>
// kernel: tpu_custom_call.1
= control target key start
LH: loop header
LB: loop body
LE: loop exit
PB: predicated region body
PF: predicated region fallthrough
CT: control target
= control target key end

     0   :  { %s884_s0 = inlined_call_operand.vmem [shape: f32[32,128], index: 0, kind: input, shape index: {}]   ;;  %s885_s1 = inlined_call_operand.vmem [shape: f32[32,32], index: 1, kind: input, shape index: {}]   ;;  %s886_s2 = inlined_call_operand.vmem [shape: f32[128,32], index: 2, kind: input, shape index: {}]   ;;  %s887_s3 = inlined_call_operand.vmem [shape: f32[1,32], index: 3, kind: input, shape index: {}]   ;;  %s888_s4 = inlined_call_operand.vmem [shape: f32[32,128], index: 4, kind: input, shape index: {}]   ;;  %s889_s5 = inlined_call_operand.vmem [shape: f32[1,128], index: 5, kind: input, shape index: {}]   ;;  %s890_s6 = inlined_call_operand.hbm [shape: f32[32,128], index: 6, kind: output, shape index: {}]  }
   0x1   :  { %v49_v0 = vld [vmem:[%s886_s2] sm:$0xff]  ;;  %v50_v1 = vld [vmem:[%s886_s2 + $0x8] sm:$0xff]  ;;  %v51_v2 = vld [vmem:[%s886_s2 + $0x10] sm:$0xff] }
   0x2   :  { %v617_v3 = vpack.c.bf16 %v50_v1, %v49_v0  ;;  %v52_v4 = vld [vmem:[%s886_s2 + $0x18] sm:$0xff]  ;;  %v53_v6 = vld [vmem:[%s886_s2 + $0x20] sm:$0xff]  ;;  %v54_v7 = vld [vmem:[%s886_s2 + $0x28] sm:$0xff] }
   0x3   :  { %v621_v5 = vpack.c.bf16 %v52_v4, %v51_v2  ;;  %v625_v8 = vpack.c.bf16 %v54_v7, %v53_v6  ;;  %v45_v9 = vld [vmem:[%s884_s0] sm:$0xff]  ;;  %v55_v10 = vld [vmem:[%s886_s2 + $0x30] sm:$0xff]  ;;  %v56_v11 = vld [vmem:[%s886_s2 + $0x38] sm:$0xff] }
   0x4   :  { %618 = vmatprep.subr.bf16.mxu0 %v617_v3  ;;  %569 = vmatprep.mubr.f32.mxu0 %v45_v9 }
   0x5   :  { %620 = vmatpush3.bf16.msra.mxu0 %v617_v3 }
   0x6   :  { %622 = vmatprep.subr.bf16.mxu0 %v621_v5 }
   0x7   :  { %11 = vsyncpa [#allocation3], 0  ;;  %v629_v12 = vpack.c.bf16 %v56_v11, %v55_v10  ;;  %v57_v13 = vld [vmem:[%s886_s2 + $0x40] sm:$0xff]  ;;  %v58_v14 = vld [vmem:[%s886_s2 + $0x48] sm:$0xff]  ;;  %vm28_vm0 = vcmask 261120  }
   0x8   :  { %v633_v15 = vpack.c.bf16 %v58_v14, %v57_v13  ;;  %v59_v16 = vld [vmem:[%s886_s2 + $0x50] sm:$0xff]  ;;  %v60_v17 = vld [vmem:[%s886_s2 + $0x58] sm:$0xff]  ;;  %v61_v19 = vld [vmem:[%s886_s2 + $0x60] sm:$0xff] }
   0x9   :  { %624 = vmatpush3.bf16.msra.mxu0 %v621_v5  ;;  %v637_v18 = vpack.c.bf16 %v60_v17, %v59_v16  ;;  %v62_v20 = vld [vmem:[%s886_s2 + $0x68] sm:$0xff]  ;;  %v63_v22 = vld [vmem:[%s886_s2 + $0x70] sm:$0xff]  ;;  %v64_v23 = vld [vmem:[%s886_s2 + $0x78] sm:$0xff] }
   0xa   :  { %626 = vmatprep.subr.bf16.mxu0 %v625_v8  ;;  %v641_v21 = vpack.c.bf16 %v62_v20, %v61_v19  ;;  %v645_v24 = vpack.c.bf16 %v64_v23, %v63_v22  ;;  %v46_v25 = vld [vmem:[%s884_s0 + $0x8] sm:$0xff]  ;;  %v47_v26 = vld [vmem:[%s884_s0 + $0x10] sm:$0xff]  ;;  %v48_v27 = vld [vmem:[%s884_s0 + $0x18] sm:$0xff] }
   0xb   :  { %v809_v28 = vld [vmem:[%s885_s1] sm:$0xff]  ;;  %v816_v29 = vld [vmem:[%s885_s1 + $0x10] sm:$0xff]  ;;  %v825_v32 = vld [vmem:[%s885_s1 + $0x8] sm:$0xff] }
   0xc   :  { %583 = vmatprep.mubr.msk.f32.mxu1 %vm28_vm0, %v809_v28  ;;  %v29_v30 = vsel %vm28_vm0, %v809_v28, 0.0  ;;  %v35_v31 = vsel %vm28_vm0, %v816_v29, 0.0  ;;  %v830_v33 = vld [vmem:[%s885_s1 + $0x18] sm:$0xff]  ;;  %v32_v34 = vsel %vm28_vm0, %v825_v32, 0.0  ;;  %v479_v36 = vld [vmem:[%s887_s3] ss:$0 sm:$0xff] }
   0xd   :  { %628 = vmatpush3.bf16.msra.mxu0 %v625_v8  ;;  %30 = vadd.xlane.f32.xlu0 %v29_v30  ;;  %v38_v35 = vsel %vm28_vm0, %v830_v33, 0.0  ;;  %v262_v45 = vld [vmem:[%s888_s4] sm:$0xff]  ;;  %v263_v46 = vld [vmem:[%s888_s4 + $0x8] sm:$0xff]  ;;  %v264_v50 = vld [vmem:[%s888_s4 + $0x10] sm:$0xff] }
   0xe   :  { %630 = vmatprep.subr.bf16.mxu0 %v629_v12  ;;  %36 = vadd.xlane.f32.xlu1 %v35_v31  ;;  %v657_v49 = vpack.c.bf16 %v263_v46, %v262_v45  ;;  %v265_v51 = vld [vmem:[%s888_s4 + $0x18] sm:$0xff]  ;;  %v484_v9 = vld [vmem:[%s889_s5] ss:$0 sm:$0xff]  ;;  %s708_s5 = smov [#allocation2]  }
   0xf   :  { %v661_v52 = vpack.c.bf16 %v265_v51, %v264_v50  ;;  %s468_s28 = sshll.u32 %s708_s5, 4  ;;  %s469_s28 = int_to_ptr.vmem [resolvable:$true] %s468_s28 }
  0x10   :  { %s684_s29 = scalar_lea.vmem %s469_s28, 512  ;;  %p689_p1 = scmp.lt.s32.totalorder %s469_s28, %s469_s28 }
  0x11   :  { %632 = vmatpush3.bf16.msra.mxu0 %v629_v12  ;;  %33 = vadd.xlane.f32.xlu0 %v32_v34  ;;  %p685_p0 = scmp.ne.s32.totalorder %s469_s28, %s684_s29  ;;  %p690_p2 = scmp.lt.s32.totalorder %s684_s29, %s684_s29 }
  0x12   :  { %634 = vmatprep.subr.bf16.mxu0 %v633_v15  ;;  %39 = vadd.xlane.f32.xlu1 %v38_v35 }
  0x13   :  { %p691_p3 = por %p690_p2, %p689_p1 }
  0x15   :  { %636 = vmatpush3.bf16.msra.mxu0 %v633_v15  ;;  %p692_p4 = pnand %p691_p3, %p685_p0 }
  0x16   :  { %638 = vmatprep.subr.bf16.mxu0 %v637_v18 }
  0x19   :  { %640 = vmatpush3.bf16.msra.mxu0 %v637_v18 }
  0x1a   :  { %642 = vmatprep.subr.bf16.mxu0 %v641_v21 }
  0x1d   :  { %644 = vmatpush3.bf16.msra.mxu0 %v641_v21 }
  0x1e   :  { %646 = vmatprep.subr.bf16.mxu0 %v645_v24 }
  0x21   :  { %648 = vmatpush3.bf16.msra.mxu0 %v645_v24 }
  0x24   :  { %570 = vmatmul.mubr.f32.vlgmr.msra.gmra.mrb[0].mxu0 %v46_v25 }
  0x25   :  { %572 = vmatprep.mubr.f32.mxu0 %v47_v26 }
  0x28   :  { %573 = vmatmul.mubr.f32.gmra.mrb[2].mxu0 %v48_v27 }
  0x9a   :  { %v31_v53 = vpop.xlane.xlu0 %30 }
  0x9b   :  { %v37_v54 = vpop.xlane.xlu1 %36 }
  0x9e   :  { %v34_v55 = vpop.xlane.xlu0 %33 }
  0x9f   :  { %676 = vrcp.f32 %v34_v55  ;;  %v40_v56 = vpop.xlane.xlu1 %39 }
  0xa0   :  { %678 = vrcp.f32 %v31_v53 }
  0xa1   :  { %680 = vrcp.f32 %v40_v56 }
  0xa2   :  { %682 = vrcp.f32 %v37_v54 }
  0xa9   :  { %v677_v57 = vpop.eup %676 }
  0xaa   :  { %v679_v59 = vpop.eup %678 }
  0xab   :  { %v681_v62 = vpop.eup %680 }
  0xac   :  { %v683_v2 = vpop.eup %682 }
  0xf7   :  { %v571_v37 = vpop.f32.mrb[0].mxu0 }
  0xf8   :  { %v144_v38 = vadd.f32 %v571_v37, %v479_v36  ;;  %v138_v39 = vpop.f32.mrb[1].mxu0 }
  0xf9   :  { %v139_v40 = vadd.f32 %v479_v36, %v138_v39 }
  0xfb   :  { %v574_v41 = vpop.f32.mrb[2].mxu0  ;;  %v649_v42 = vpack.c.bf16 %v144_v38, %v139_v40 }
  0xfc   :  { %v154_v43 = vadd.f32 %v574_v41, %v479_v36  ;;  %v148_v44 = vpop.f32.mrb[3].mxu0 }
  0xfd   :  { %v149_v47 = vadd.f32 %v479_v36, %v148_v44  ;;  %650 = vmatprep.subr.bf16.mxu1 %v649_v42 }
  0xfe   :  { %652 = vmatpush3.bf16.msra.mxu1 %v649_v42 }
  0xff   :  { %v653_v48 = vpack.c.bf16 %v154_v43, %v149_v47 }
 0x101   :  { %654 = vmatprep.subr.bf16.mxu1 %v653_v48 }
 0x102   :  { %656 = vmatpush3.bf16.msra.mxu1 %v653_v48 }
 0x103   :  { %658 = vmatprep.subr.bf16.mxu1 %v657_v49 }
 0x105   :  { %584 = vmatmul.mubr.msk.f32.vlgmr.msra.gmra.mrb[0].mxu1 %vm28_vm0, %v825_v32 }
 0x106   :  { %586 = vmatprep.mubr.msk.f32.mxu1 %vm28_vm0, %v816_v29  ;;  %660 = vmatpush3.bf16.msra.mxu1 %v657_v49 }
 0x107   :  { %662 = vmatprep.subr.bf16.mxu1 %v661_v52 }
 0x109   :  { %587 = vmatmul.mubr.msk.f32.gmra.mrb[2].mxu1 %vm28_vm0, %v830_v33 }
 0x10a   :  { %664 = vmatpush3.bf16.msra.mxu1 %v661_v52 }
 0x1d8   :  { %v585_v58 = vpop.f32.mrb[0].mxu1 }
 0x1d9   :  { %v255_v60 = vmul.f32 %v677_v57, %v585_v58  ;;  %v235_v61 = vpop.f32.mrb[1].mxu1 }
 0x1da   :  { %v254_v63 = vmul.f32 %v679_v59, %v235_v61 }
 0x1db   :  { %v259_v3 = vmax.f32 %v255_v60, 0.0 }
 0x1dc   :  { %v258_v0 = vmax.f32 %v254_v63, 0.0  ;;  %v588_v1 = vpop.f32.mrb[2].mxu1 }
 0x1dd   :  { %v257_v4 = vmul.f32 %v681_v62, %v588_v1  ;;  %v245_v5 = vpop.f32.mrb[3].mxu1 }
 0x1de   :  { %v256_v6 = vmul.f32 %v683_v2, %v245_v5  ;;  %597 = vmatprep.mubr.msk.f32.mxu1 %vm28_vm0, %v258_v0 }
 0x1df   :  { %598 = vmatmul.mubr.msk.f32.vlgmr.msra.gmra.mrb[4].mxu1 %vm28_vm0, %v259_v3  ;;  %v261_v8 = vmax.f32 %v257_v4, 0.0 }
 0x1e0   :  { %v260_v7 = vmax.f32 %v256_v6, 0.0 }
 0x1e2   :  { %600 = vmatprep.mubr.msk.f32.mxu1 %vm28_vm0, %v260_v7 }
 0x1e3   :  { %601 = vmatmul.mubr.msk.f32.gmra.mrb[6].mxu1 %vm28_vm0, %v261_v8 }
 0x1e4   :  { %611 = vmatprep.mubr.msk.f32.mxu1 %vm28_vm0, %v809_v28 }
 0x2b2   :  { %v599_v10 = vpop.f32.mrb[4].mxu1 }
 0x2b3   :  { %v357_v11 = vadd.f32 %v599_v10, %v484_v9  ;;  %v351_v12 = vpop.f32.mrb[5].mxu1 }
 0x2b4   :  { %v352_v13 = vadd.f32 %v484_v9, %v351_v12 }
 0x2b6   :  { %v665_v14 = vpack.c.bf16 %v357_v11, %v352_v13  ;;  %v602_v15 = vpop.f32.mrb[6].mxu1 }
 0x2b7   :  { %v367_v16 = vadd.f32 %v602_v15, %v484_v9  ;;  %v361_v17 = vpop.f32.mrb[7].mxu1 }
 0x2b8   :  { %v362_v18 = vadd.f32 %v484_v9, %v361_v17  ;;  %666 = vmatprep.subr.bf16.mxu1 %v665_v14 }
 0x2b9   :  { %668 = vmatpush3.bf16.msra.mxu1 %v665_v14 }
 0x2ba   :  { %v669_v19 = vpack.c.bf16 %v367_v16, %v362_v18 }
 0x2bc   :  { %670 = vmatprep.subr.bf16.mxu1 %v669_v19 }
 0x2bd   :  { %672 = vmatpush3.bf16.msra.mxu1 %v669_v19 }
 0x2c0   :  { %612 = vmatmul.mubr.msk.f32.vlgmr.msra.gmra.mrb[8].mxu1 %vm28_vm0, %v825_v32 }
 0x2c1   :  { %614 = vmatprep.mubr.msk.f32.mxu1 %vm28_vm0, %v816_v29 }
 0x2c4   :  { %615 = vmatmul.mubr.msk.f32.gmra.mrb[10].mxu1 %vm28_vm0, %v830_v33 }
 0x393   :  { %v613_v20 = vpop.f32.mrb[8].mxu1 }
 0x394   :  { %v456_v21 = vmul.f32 %v677_v57, %v613_v20  ;;  %v436_v22 = vpop.f32.mrb[9].mxu1 }
 0x395   :  { %v455_v23 = vmul.f32 %v679_v59, %v436_v22 }
 0x396   :  { %460 = vst [vmem:[#allocation2 + $0x8] sm:$0xff] %v456_v21 }
 0x397   :  { %459 = vst [vmem:[#allocation2] sm:$0xff] %v455_v23  ;;  %v616_v24 = vpop.f32.mrb[10].mxu1 }
 0x398   :  { %v458_v25 = vmul.f32 %v681_v62, %v616_v24  ;;  %v446_v26 = vpop.f32.mrb[11].mxu1 }
 0x399   :  { %v457_v27 = vmul.f32 %v683_v2, %v446_v26 }
 0x39a   :  { %462 = vst [vmem:[#allocation2 + $0x18] sm:$0xff] %v458_v25 }
 0x39b   :  { %461 = vst [vmem:[#allocation2 + $0x10] sm:$0xff] %v457_v27 }
 0x39c   :  { %695 = shalt.err (!%p692_p4)
}
 0x39d   :  { %s696_s8 = scalar_lea.hbm %s890_s6, 512 }
 0x39e   :  { %p697_p5 = scmp.ne.s32.totalorder %s890_s6, %s696_s8  ;;  %p700_p6 = scmp.lt.u32.totalorder %s696_s8, %s890_s6 }
 0x3a0   :  { %p702_p7 = pnand %p700_p6, %p697_p5 }
 0x3a2   :  { %705 = shalt.err (!%p702_p7)
}
 0x3a3   :  { %s709_s2 = smov 128   ;;  %s710_s13 = smov 8  }
 0x3a4   :  { %474 = dma.vmem_to_hbm [thread:$0]  %s469_s28, 512, %s890_s6, [#allocation3], %s709_s2, %s709_s2, %s710_s13  }
 0x3a5   :  { %706 = dma.done.wait [#allocation3], 512  }
 0x3a6   :  { %707 = vsyncadd [#allocation3], 4294966784 }
 0x3a7   :  { %478 = vsyncpa [#allocation3], 1 }

</bundles_post_ra>
